<compile_context>
chip_gen: v7x
topology: tpu7x:2x2x1
jax: 0.10.0
libtpu: 0.0.40
codegen_flags: <defaults>
</compile_context>

<pallas_src>
import functools
import math

import numpy as np

import jax
import jax.numpy as jnp
from jax import lax
from jax.experimental import pallas as pl
from jax.experimental.pallas import tpu as pltpu

MASK_VALUE = -1000000.0  # matches the PyTorch module exactly

_INT32_MIN = -(2 ** 31)
# Order-preserving int32 key of float32 -inf (lower bound for the bisection).
_F32_NEG_INF_BITS = int(np.array(-np.inf, dtype=np.float32).view(np.int32))
_NEG_INF_KEY = _INT32_MIN - _F32_NEG_INF_BITS          # == -2139095040

_BISECTION_MIN_K = 13     # use bisection when k >= 13, unrolled extract-one below
_BISECTION_ITERS = 32     # enough to collapse any f32 key interval to a point


def _sparse_attention_kernel(vl_ref,   # VMEM (BB, 1, 1) int32
                             q_ref,    # VMEM (BB, TQ, D)   native dtype
                             k_ref,    # VMEM (BB, K,  D)   native dtype
                             v_ref,    # VMEM (BB, K,  Dvp) native dtype
                             o_ref,    # VMEM (BB, TQ, Dvp)
                             *, k_top, scale):
    q = q_ref[...]
    k = k_ref[...]
    v = v_ref[...]

    # Fold 1/sqrt(D) into q: scales BB*TQ*D elements instead of BB*TQ*K.
    q = q * jnp.asarray(scale, dtype=q.dtype)

    # scores = q @ k^T, contracted on D directly; native-dtype MXU operands,
    # f32 accumulation.  (bf16 inputs run the MXU at full rate; f32 inputs are
    # multi-pass but bit-faithful to the torch module.)
    scores = jnp.einsum('bqd,bkd->bqk', q, k,
                        preferred_element_type=jnp.float32)      # (BB, TQ, K)

    key_num = scores.shape[-1]
    # (1,1,K) iota — broadcast in the compares, no (BB,TQ,K) int temporary.
    key_idx = lax.broadcasted_iota(jnp.int32, (1, 1, key_num), 2)
    vlen = vl_ref[...]                                           # (BB, 1, 1)
    scores = jnp.where(key_idx < vlen, scores, MASK_VALUE)

    if k_top < _BISECTION_MIN_K:
        # Small k: extract the max k times (duplicates counted, like
        # torch.topk), removing exactly one (leftmost) occurrence per step.
        def extract_one(remaining):
            m = jnp.max(remaining, axis=-1, keepdims=True)
            cand = jnp.where(remaining == m, key_idx, key_num)
            hit = jnp.min(cand, axis=-1, keepdims=True)
            remaining = jnp.where(key_idx == hit, -jnp.inf, remaining)
            return remaining, m

        remaining, kth = extract_one(scores)
        row_max = kth            # first extracted max == row max (reused below)
        for _ in range(k_top - 1):
            remaining, kth = extract_one(remaining)
        keep = scores >= kth
    else:
        # Large k: O(1)-in-k bisection on an order-preserving int32 key.
        row_max = jnp.max(scores, axis=-1, keepdims=True)        # reused below
        int_min = jnp.int32(_INT32_MIN)
        bits = pltpu.bitcast(scores, jnp.int32)
        ordered = jnp.where(bits >= 0, bits, int_min - bits)     # monotone in scores
        hi_bits = pltpu.bitcast(row_max, jnp.int32)
        hi = jnp.where(hi_bits >= 0, hi_bits, int_min - hi_bits)
        lo = jnp.full_like(hi, _NEG_INF_KEY)

        def bisect(_, carry):
            lo_c, hi_c = carry
            # Overflow-safe ceil((lo+hi)/2).
            mid = (lo_c | hi_c) - ((lo_c ^ hi_c) >> 1)
            cnt = jnp.sum(jnp.where(ordered >= mid, 1.0, 0.0),
                          axis=-1, keepdims=True)
            ge = cnt >= k_top
            return jnp.where(ge, mid, lo_c), jnp.where(ge, hi_c, mid - 1)

        lo, _ = lax.fori_loop(0, _BISECTION_ITERS, bisect, (lo, hi))
        # lo is now the key of the k-th largest score (duplicates counted).
        keep = ordered >= lo

    # Sparsify: everything strictly below the k-th largest value is masked out.
    scores = jnp.where(keep, scores, MASK_VALUE)

    # Numerically-stable softmax; normalization is applied AFTER the PV matmul
    # so the broadcast multiply touches Dv elements per row instead of K, and
    # the approximate reciprocal runs on the otherwise-idle EUP.
    p = jnp.exp(scores - row_max)
    denom = jnp.sum(p, axis=-1, keepdims=True)

    out = jnp.einsum('bqk,bkv->bqv', p.astype(v.dtype), v,
                     preferred_element_type=jnp.float32)
    out = out * pl.reciprocal(denom, approx=True)
    o_ref[...] = out.astype(o_ref.dtype)


def _round_up(x, m):
    return -(-x // m) * m


def _tpu_defaults():
    """Generation-aware (tq_target, vmem_limit_bytes, block_footprint_cap)."""
    kind = ""
    try:
        kind = jax.devices()[0].device_kind.lower().replace(" ", "")
    except Exception:
        pass
    is_v5e = ("v5lite" in kind) or ("v5e" in kind)
    tq_target = 128 if is_v5e else 256          # 128x128 MXUs vs 256x256 MXU

    vmem_bytes = None
    try:
        vmem_bytes = int(pltpu.get_tpu_info().vmem_capacity_bytes)
    except Exception:
        vmem_bytes = None

    mib = 1024 * 1024
    if vmem_bytes is None:
        # Unknown generation: conservative, known-good budgets.
        return tq_target, 64 * mib, 24 * mib
    if vmem_bytes <= 64 * mib:
        # v7x-class: 64 MiB / TensorCore -> leave headroom for compiler scratch.
        limit = max(16 * mib, min(52 * mib, vmem_bytes - 12 * mib))
        return tq_target, limit, 20 * mib
    # v5e / v6e: 128 MiB physical -> use most of it so blocks can grow.
    limit = max(16 * mib, min(100 * mib, vmem_bytes - 24 * mib))
    return tq_target, limit, 64 * mib


def sparse_attention(queries, keys, values, valid_lens, k,
                     *, block_q=None, block_b=None):
    """Pallas implementation of SparseAttention.forward.

    Note: the module's `dropout` constructor argument is unused in forward.
    """
    assert k >= 1, "top-k must be >= 1"
    B, Q, D = queries.shape
    _, Kn, Dv = values.shape
    assert keys.shape == (B, Kn, D)
    k_eff = min(k, Kn)
    itemsize = jnp.dtype(queries.dtype).itemsize

    tq_target, vmem_limit, footprint_cap = _tpu_defaults()

    # Lane-dense output: pad the value/output feature dim to a multiple of 128
    # so the final store is an unmasked full-lane vst.  The zero padding
    # contributes exact zeros and is sliced off below.
    dv_pad = _round_up(Dv, 128)
    if dv_pad != Dv:
        values = jnp.pad(values, ((0, 0), (0, 0), (0, dv_pad - Dv)))

    # TQ is the MXU knob (one (TQ,D)x(D,Kn) matmul per batch element).
    if block_q is None:
        block_q = tq_target
    tq = Q if Q <= block_q else block_q
    q_pad = _round_up(Q, tq)

    # VMEM footprint model (lane / sublane padded, double-buffered blocks plus
    # live f32/i32 (TQ,K) temporaries and the (bb,1,1) valid-len tiles).
    sub = max(8, 32 // itemsize)                 # sublane multiple for the dtype
    d_lanes = _round_up(D, 128)
    k_lanes = _round_up(Kn, 128)
    kn_sub = _round_up(Kn, sub)
    tq_sub = _round_up(tq, sub)

    def footprint(bbv):
        io = 2 * bbv * (tq_sub * d_lanes          # q blocks
                        + kn_sub * d_lanes        # k blocks
                        + kn_sub * dv_pad         # v blocks
                        + tq_sub * dv_pad         # out blocks
                        ) * itemsize
        io += 2 * bbv * 8 * 128 * 4               # (1,1) valid-len tiles
        tmp = 4 * bbv * _round_up(tq, 8) * k_lanes * 4   # scores/ordered/p/keep
        return io + tmp

    # BB only amortizes per-step overhead / fills VMEM up to the cap.
    if block_b is None:
        block_b = min(B, max(1, 4096 // max(tq, 1)))
        while block_b > 1 and footprint(block_b) > footprint_cap:
            block_b -= 1
    bb = min(block_b, B)
    b_pad = _round_up(B, bb)

    # Pad batch / query dims (padded rows are computed then sliced off; masked
    # scores use -1e6, never -inf, so no NaNs can appear).
    if b_pad != B or q_pad != Q:
        queries = jnp.pad(queries, ((0, b_pad - B), (0, q_pad - Q), (0, 0)))
    if b_pad != B:
        keys = jnp.pad(keys, ((0, b_pad - B), (0, 0), (0, 0)))
        values = jnp.pad(values, ((0, b_pad - B), (0, 0), (0, 0)))
        valid_lens = jnp.pad(valid_lens, (0, b_pad - B), constant_values=Kn)
    vl = valid_lens.astype(jnp.int32).reshape(b_pad, 1, 1)

    kernel = functools.partial(_sparse_attention_kernel,
                               k_top=k_eff, scale=1.0 / math.sqrt(D))
    grid = (b_pad // bb, q_pad // tq)

    out = pl.pallas_call(
        kernel,
        out_shape=jax.ShapeDtypeStruct((b_pad, q_pad, dv_pad), queries.dtype),
        grid_spec=pltpu.PrefetchScalarGridSpec(
            num_scalar_prefetch=0,
            grid=grid,
            in_specs=[
                pl.BlockSpec((bb, 1, 1), lambda b, qt: (b, 0, 0)),
                pl.BlockSpec((bb, tq, D), lambda b, qt: (b, qt, 0)),
                pl.BlockSpec((bb, Kn, D), lambda b, qt: (b, 0, 0)),
                pl.BlockSpec((bb, Kn, dv_pad), lambda b, qt: (b, 0, 0)),
            ],
            out_specs=pl.BlockSpec((bb, tq, dv_pad), lambda b, qt: (b, qt, 0)),
        ),
        compiler_params=pltpu.CompilerParams(
            # Megacore shards on the batch axis only; the inner q-tile axis is
            # "arbitrary" so each (bb,Kn,*) K/V block is DMA'd exactly once.
            dimension_semantics=("parallel", "arbitrary"),
            vmem_limit_bytes=vmem_limit,
        ),
    )(vl, queries, keys, values)

    if b_pad != B or q_pad != Q or dv_pad != Dv:
        out = out[:B, :Q, :Dv]
    return out


def _reference(queries, keys, values, valid_lens, k):
    """Pure-JAX reference mirroring the PyTorch forward."""
    d = queries.shape[-1]
    scores = jnp.einsum('bqd,bkd->bqk', queries, keys) / math.sqrt(d)
    key_num = scores.shape[-1]
    idx = jnp.arange(key_num)
    mask = idx[None, None, :] < valid_lens[:, None, None]
    scores = jnp.where(mask, scores, MASK_VALUE)
    k_eff = min(k, key_num)
    kth = jnp.sort(scores, axis=-1)[..., key_num - k_eff][..., None]
    scores = jnp.where(scores < kth, MASK_VALUE, scores)
    weights = jax.nn.softmax(scores, axis=-1)
    return jnp.einsum('bqk,bkv->bqv', weights, values)


if __name__ == "__main__":
    # --- Test 1: module-scale shapes, small k (unrolled extract-one path). ---
    TOP_K = 3
    B, Q, Kn, D, Dv = 2, 8, 8, 32, 32
    kq, kk, kv = jax.random.split(jax.random.PRNGKey(0), 3)
    queries = jax.random.normal(kq, (B, Q, D), dtype=jnp.float32)
    keys_t = jax.random.normal(kk, (B, Kn, D), dtype=jnp.float32)
    values = jax.random.normal(kv, (B, Kn, Dv), dtype=jnp.float32)
    valid_lens = jnp.array([5, 8], dtype=jnp.int32)

    out = jax.block_until_ready(
        sparse_attention(queries, keys_t, values, valid_lens, TOP_K))
    ref = _reference(queries, keys_t, values, valid_lens, TOP_K)
    assert out.shape == (B, Q, Dv)
    assert jnp.allclose(out, ref, atol=5e-3, rtol=5e-3), "mismatch (k=3)"

    # --- Test 2: larger k (bisection path), q-tiling/padding, Dv not 128. ---
    TOP_K2 = 16
    B2, Q2, Kn2, D2, Dv2 = 2, 300, 40, 16, 24
    kq2, kk2, kv2 = jax.random.split(jax.random.PRNGKey(1), 3)
    q2 = jax.random.normal(kq2, (B2, Q2, D2), dtype=jnp.float32)
    k2 = jax.random.normal(kk2, (B2, Kn2, D2), dtype=jnp.float32)
    v2 = jax.random.normal(kv2, (B2, Kn2, Dv2), dtype=jnp.float32)
    vl2 = jnp.array([13, 40], dtype=jnp.int32)

    out2 = jax.block_until_ready(sparse_attention(q2, k2, v2, vl2, TOP_K2))
    ref2 = _reference(q2, k2, v2, vl2, TOP_K2)
    assert out2.shape == (B2, Q2, Dv2)
    assert jnp.allclose(out2, ref2, atol=5e-3, rtol=5e-3), "mismatch (k=16)"

    print("KERNEL_OK")
</pallas_src>

<mosaic_0001>
module attributes {stable_mosaic.version = 11 : i64} {
  func.func @_sparse_attention_kernel(%arg0: i32, %arg1: i32, %arg2: memref<2x1x1xi32, #tpu.memory_space<vmem>>, %arg3: memref<2x8x32xf32, #tpu.memory_space<vmem>>, %arg4: memref<2x8x32xf32, #tpu.memory_space<vmem>>, %arg5: memref<2x8x128xf32, #tpu.memory_space<vmem>>, %arg6: memref<2x8x128xf32, #tpu.memory_space<vmem>>) attributes {dimension_semantics = [#tpu.dimension_semantics<parallel>, #tpu.dimension_semantics<arbitrary>], iteration_bounds = array<i64: 1, 1>, scalar_prefetch = 0 : i64, scratch_operands = 0 : i64, tpu.core_type = #tpu.core_type<tc>, window_params = [{transform_indices = @transform_0, window_bounds = array<i64: 2, 1, 1>}, {transform_indices = @transform_1, window_bounds = array<i64: 2, 8, 32>}, {transform_indices = @transform_2, window_bounds = array<i64: 2, 8, 32>}, {transform_indices = @transform_3, window_bounds = array<i64: 2, 8, 128>}, {transform_indices = @transform_4, window_bounds = array<i64: 2, 8, 128>}]} {
    %c0 = arith.constant 0 : index
    %c0_0 = arith.constant 0 : index
    %c0_1 = arith.constant 0 : index
    %0 = vector.load %arg3[%c0, %c0_0, %c0_1] : memref<2x8x32xf32, #tpu.memory_space<vmem>>, vector<2x8x32xf32>
    %c0_2 = arith.constant 0 : index
    %c0_3 = arith.constant 0 : index
    %c0_4 = arith.constant 0 : index
    %1 = vector.load %arg4[%c0_2, %c0_3, %c0_4] : memref<2x8x32xf32, #tpu.memory_space<vmem>>, vector<2x8x32xf32>
    %c0_5 = arith.constant 0 : index
    %c0_6 = arith.constant 0 : index
    %c0_7 = arith.constant 0 : index
    %2 = vector.load %arg5[%c0_5, %c0_6, %c0_7] : memref<2x8x128xf32, #tpu.memory_space<vmem>>, vector<2x8x128xf32>
    %cst = arith.constant 0.176776692 : f32
    %3 = vector.broadcast %cst : f32 to vector<2x8x32xf32>
    %4 = arith.mulf %0, %3 : vector<2x8x32xf32>
    "tpu.trace_start"() <{level = 10 : i32, message = "bqd,bkd->bqk"}> : () -> ()
    %cst_8 = arith.constant dense<0.000000e+00> : vector<2x8x8xf32>
    %5 = tpu.matmul %4, %1, %cst_8 {dimension_numbers = #tpu.dot_dimension_numbers<[2], [2], [1], [1], [0, 0, 0, 1, 1, 1], [0], [0]>} : vector<2x8x32xf32>, vector<2x8x32xf32>, vector<2x8x8xf32> -> vector<2x8x8xf32>
    "tpu.trace_stop"() : () -> ()
    %6 = tpu.iota {dimensions = array<i32: 2>} : vector<1x1x8xi32>
    %c0_9 = arith.constant 0 : index
    %c0_10 = arith.constant 0 : index
    %c0_11 = arith.constant 0 : index
    %7 = vector.load %arg2[%c0_9, %c0_10, %c0_11] : memref<2x1x1xi32, #tpu.memory_space<vmem>>, vector<2x1x1xi32>
    %8 = vector.broadcast %6 : vector<1x1x8xi32> to vector<2x1x8xi32>
    %9 = vector.broadcast %7 : vector<2x1x1xi32> to vector<2x1x8xi32>
    %10 = arith.cmpi slt, %8, %9 : vector<2x1x8xi32>
    %cst_12 = arith.constant -1.000000e+06 : f32
    %11 = vector.shape_cast %10 : vector<2x1x8xi1> to vector<2x1x8xi1>
    %12 = vector.broadcast %11 : vector<2x1x8xi1> to vector<2x8x8xi1>
    %13 = vector.broadcast %cst_12 : f32 to vector<2x8x8xf32>
    %14 = arith.select %12, %5, %13 : vector<2x8x8xi1>, vector<2x8x8xf32>
    %cst_13 = arith.constant dense<0xFF800000> : vector<2x8xf32>
    %15 = vector.multi_reduction <maximumf>, %14, %cst_13 [2] : vector<2x8x8xf32> to vector<2x8xf32>
    %16 = vector.shape_cast %15 : vector<2x8xf32> to vector<2x8x1xf32>
    %17 = vector.broadcast %16 : vector<2x8x1xf32> to vector<2x8x8xf32>
    %18 = arith.cmpf oeq, %14, %17 : vector<2x8x8xf32>
    %c8_i32 = arith.constant 8 : i32
    %19 = vector.shape_cast %6 : vector<1x1x8xi32> to vector<1x1x8xi32>
    %20 = vector.broadcast %19 : vector<1x1x8xi32> to vector<2x8x8xi32>
    %21 = vector.broadcast %c8_i32 : i32 to vector<2x8x8xi32>
    %22 = arith.select %18, %20, %21 : vector<2x8x8xi1>, vector<2x8x8xi32>
    %cst_14 = arith.constant dense<2147483647> : vector<2x8xi32>
    %23 = vector.multi_reduction <minsi>, %22, %cst_14 [2] : vector<2x8x8xi32> to vector<2x8xi32>
    %24 = vector.shape_cast %23 : vector<2x8xi32> to vector<2x8x1xi32>
    %25 = vector.broadcast %6 : vector<1x1x8xi32> to vector<2x8x8xi32>
    %26 = vector.broadcast %24 : vector<2x8x1xi32> to vector<2x8x8xi32>
    %27 = arith.cmpi eq, %25, %26 : vector<2x8x8xi32>
    %cst_15 = arith.constant 0xFF800000 : f32
    %28 = vector.broadcast %cst_15 : f32 to vector<2x8x8xf32>
    %29 = arith.select %27, %28, %14 : vector<2x8x8xi1>, vector<2x8x8xf32>
    %cst_16 = arith.constant dense<0xFF800000> : vector<2x8xf32>
    %30 = vector.multi_reduction <maximumf>, %29, %cst_16 [2] : vector<2x8x8xf32> to vector<2x8xf32>
    %31 = vector.shape_cast %30 : vector<2x8xf32> to vector<2x8x1xf32>
    %32 = vector.broadcast %31 : vector<2x8x1xf32> to vector<2x8x8xf32>
    %33 = arith.cmpf oeq, %29, %32 : vector<2x8x8xf32>
    %c8_i32_17 = arith.constant 8 : i32
    %34 = vector.shape_cast %6 : vector<1x1x8xi32> to vector<1x1x8xi32>
    %35 = vector.broadcast %34 : vector<1x1x8xi32> to vector<2x8x8xi32>
    %36 = vector.broadcast %c8_i32_17 : i32 to vector<2x8x8xi32>
    %37 = arith.select %33, %35, %36 : vector<2x8x8xi1>, vector<2x8x8xi32>
    %cst_18 = arith.constant dense<2147483647> : vector<2x8xi32>
    %38 = vector.multi_reduction <minsi>, %37, %cst_18 [2] : vector<2x8x8xi32> to vector<2x8xi32>
    %39 = vector.shape_cast %38 : vector<2x8xi32> to vector<2x8x1xi32>
    %40 = vector.broadcast %6 : vector<1x1x8xi32> to vector<2x8x8xi32>
    %41 = vector.broadcast %39 : vector<2x8x1xi32> to vector<2x8x8xi32>
    %42 = arith.cmpi eq, %40, %41 : vector<2x8x8xi32>
    %cst_19 = arith.constant 0xFF800000 : f32
    %43 = vector.broadcast %cst_19 : f32 to vector<2x8x8xf32>
    %44 = arith.select %42, %43, %29 : vector<2x8x8xi1>, vector<2x8x8xf32>
    %cst_20 = arith.constant dense<0xFF800000> : vector<2x8xf32>
    %45 = vector.multi_reduction <maximumf>, %44, %cst_20 [2] : vector<2x8x8xf32> to vector<2x8xf32>
    %46 = vector.shape_cast %45 : vector<2x8xf32> to vector<2x8x1xf32>
    %47 = vector.broadcast %46 : vector<2x8x1xf32> to vector<2x8x8xf32>
    %48 = arith.cmpf oge, %14, %47 : vector<2x8x8xf32>
    %cst_21 = arith.constant -1.000000e+06 : f32
    %49 = vector.broadcast %cst_21 : f32 to vector<2x8x8xf32>
    %50 = arith.select %48, %14, %49 : vector<2x8x8xi1>, vector<2x8x8xf32>
    %51 = vector.broadcast %16 : vector<2x8x1xf32> to vector<2x8x8xf32>
    %52 = arith.subf %50, %51 : vector<2x8x8xf32>
    %53 = math.exp %52 : vector<2x8x8xf32>
    %cst_22 = arith.constant dense<0.000000e+00> : vector<2x8xf32>
    %54 = vector.multi_reduction <add>, %53, %cst_22 [2] : vector<2x8x8xf32> to vector<2x8xf32>
    %55 = vector.shape_cast %54 : vector<2x8xf32> to vector<2x8x1xf32>
    "tpu.trace_start"() <{level = 10 : i32, message = "bqk,bkv->bqv"}> : () -> ()
    %cst_23 = arith.constant dense<0.000000e+00> : vector<2x8x128xf32>
    %56 = tpu.matmul %53, %2, %cst_23 {dimension_numbers = #tpu.dot_dimension_numbers<[2], [1], [1], [2], [0, 0, 0, 1, 1, 2], [0], [0]>} : vector<2x8x8xf32>, vector<2x8x128xf32>, vector<2x8x128xf32> -> vector<2x8x128xf32>
    "tpu.trace_stop"() : () -> ()
    %57 = tpu.reciprocal %55 {approx = true} : vector<2x8x1xf32> -> vector<2x8x1xf32>
    %58 = vector.broadcast %57 : vector<2x8x1xf32> to vector<2x8x128xf32>
    %59 = arith.mulf %56, %58 : vector<2x8x128xf32>
    %c0_24 = arith.constant 0 : index
    %c0_25 = arith.constant 0 : index
    %c0_26 = arith.constant 0 : index
    %60 = vector.load %arg6[%c0_24, %c0_25, %c0_26] : memref<2x8x128xf32, #tpu.memory_space<vmem>>, vector<2x8x128xf32>
    tpu.vector_store %arg6[%c0_24, %c0_25, %c0_26], %59 {strides = array<i32>} : memref<2x8x128xf32, #tpu.memory_space<vmem>>, vector<2x8x128xf32>,
    return
  }
  func.func @transform_0(%arg0: i32, %arg1: i32) -> (i32, i32, i32) {
    %c0_i32 = arith.constant 0 : i32
    %c0_i32_0 = arith.constant 0 : i32
    %c0_i32_1 = arith.constant 0 : i32
    return %arg0, %c0_i32, %c0_i32_0 : i32, i32, i32
  }
  func.func @transform_1(%arg0: i32, %arg1: i32) -> (i32, i32, i32) {
    %c0_i32 = arith.constant 0 : i32
    %c0_i32_0 = arith.constant 0 : i32
    return %arg0, %arg1, %c0_i32 : i32, i32, i32
  }
  func.func @transform_2(%arg0: i32, %arg1: i32) -> (i32, i32, i32) {
    %c0_i32 = arith.constant 0 : i32
    %c0_i32_0 = arith.constant 0 : i32
    %c0_i32_1 = arith.constant 0 : i32
    return %arg0, %c0_i32, %c0_i32_0 : i32, i32, i32
  }
  func.func @transform_3(%arg0: i32, %arg1: i32) -> (i32, i32, i32) {
    %c0_i32 = arith.constant 0 : i32
    %c0_i32_0 = arith.constant 0 : i32
    %c0_i32_1 = arith.constant 0 : i32
    return %arg0, %c0_i32, %c0_i32_0 : i32, i32, i32
  }
  func.func @transform_4(%arg0: i32, %arg1: i32) -> (i32, i32, i32) {
    %c0_i32 = arith.constant 0 : i32
    %c0_i32_0 = arith.constant 0 : i32
    return %arg0, %arg1, %c0_i32 : i32, i32, i32
  }
}

</mosaic_0001>

<bundles_post_ra>
// kernel: tpu_custom_call.1
= control target key start
LH: loop header
LB: loop body
LE: loop exit
PB: predicated region body
PF: predicated region fallthrough
CT: control target
= control target key end

     0   :  { %9 = vsyncpa [#allocation3], 0  ;;  %s883_s0 = inlined_call_operand.hbm [shape: s32[2,1,1], index: 0, kind: input, shape index: {}]   ;;  %s884_s1 = inlined_call_operand.hbm [shape: f32[2,8,32], index: 1, kind: input, shape index: {}]   ;;  %s885_s2 = inlined_call_operand.hbm [shape: f32[2,8,32], index: 2, kind: input, shape index: {}]   ;;  %s886_s3 = inlined_call_operand.hbm [shape: f32[2,8,128], index: 3, kind: input, shape index: {}]   ;;  %s887_s4 = inlined_call_operand.hbm [shape: f32[2,8,128], index: 4, kind: output, shape index: {}]  }
   0x1   :  { %10 = vsyncpa [#allocation6], 0 }
   0x2   :  { %11 = vsyncpa [#allocation9], 0 }
   0x3   :  { %12 = vsyncpa [#allocation4], 0  ;;  %s715_s15 = smov [#allocation5]   ;;  %s597_s19 = scalar_lea.hbm %s884_s1, 256 }
   0x4   :  { %s30_s16 = sshll.u32 %s715_s15, 4  ;;  %p598_p0 = scmp.ne.s32.totalorder %s884_s1, %s597_s19  ;;  %s31_s16 = int_to_ptr.vmem [resolvable:$true] %s30_s16 }
   0x5   :  { %p601_p1 = scmp.lt.u32.totalorder %s597_s19, %s884_s1 }
   0x7   :  { %p603_p2 = pnand %p601_p1, %p598_p0 }
   0x9   :  { %606 = shalt.err (!%p603_p2)
}
   0xa   :  { %s607_s24 = scalar_lea.vmem %s31_s16, 256  ;;  %p612_p4 = scmp.lt.s32.totalorder %s31_s16, %s31_s16 }
   0xb   :  { %p608_p3 = scmp.ne.s32.totalorder %s31_s16, %s607_s24  ;;  %p613_p5 = scmp.lt.s32.totalorder %s607_s24, %s607_s24 }
   0xd   :  { %p614_p6 = por %p613_p5, %p612_p4 }
   0xf   :  { %p615_p7 = pnand %p614_p6, %p608_p3 }
  0x11   :  { %618 = shalt.err (!%p615_p7)
}
  0x12   :  { %s716_s25 = smov 128   ;;  %s717_s26 = smov 8  }
  0x13   :  { %36 = dma.hbm_to_vmem [thread:$0]  %s884_s1, 256, %s31_s16, [#allocation6], %s716_s25, %s716_s25, %s717_s26  }
  0x14   :  { %s718_s29 = smov [#allocation2]   ;;  %s619_s7 = scalar_lea.hbm %s883_s0, 32 }
  0x15   :  { %s18_s30 = sshll.u32 %s718_s29, 4  ;;  %p620_p8 = scmp.ne.s32.totalorder %s883_s0, %s619_s7  ;;  %s19_s30 = int_to_ptr.vmem [resolvable:$true] %s18_s30 }
  0x16   :  { %p623_p9 = scmp.lt.u32.totalorder %s619_s7, %s883_s0 }
  0x18   :  { %p625_p10 = pnand %p623_p9, %p620_p8 }
  0x1a   :  { %628 = shalt.err (!%p625_p10)
}
  0x1b   :  { %s629_s12 = scalar_lea.vmem %s19_s30, 32  ;;  %p634_p12 = scmp.lt.s32.totalorder %s19_s30, %s19_s30 }
  0x1c   :  { %p630_p11 = scmp.ne.s32.totalorder %s19_s30, %s629_s12  ;;  %p635_p13 = scmp.lt.s32.totalorder %s629_s12, %s629_s12 }
  0x1e   :  { %p636_p0 = por %p635_p13, %p634_p12 }
  0x20   :  { %p637_p1 = pnand %p636_p0, %p630_p11 }
  0x22   :  { %640 = shalt.err (!%p637_p1)
}
  0x23   :  { %s719_s1 = smov 16   ;;  %s720_s13 = smov 1  }
  0x24   :  { %24 = dma.hbm_to_vmem [thread:$0]  %s883_s0, 32, %s19_s30, [#allocation3], %s719_s1, %s719_s1, %s720_s13  }
  0x25   :  { %s721_s16 = smov [#allocation7]   ;;  %s722_s18 = smov [#allocation8]  }
  0x26   :  { %s42_s17 = sshll.u32 %s721_s16, 4  ;;  %s54_s19 = sshll.u32 %s722_s18, 4  ;;  %s43_s17 = int_to_ptr.vmem [resolvable:$true] %s42_s17  ;;  %s779_s19 = int_to_ptr.vmem [resolvable:$true] %s54_s19 }
  0x27   :  { %s641_s22 = scalar_lea.hbm %s885_s2, 256 }
  0x28   :  { %p642_p2 = scmp.ne.s32.totalorder %s885_s2, %s641_s22  ;;  %p645_p3 = scmp.lt.u32.totalorder %s641_s22, %s885_s2 }
  0x2a   :  { %p647_p4 = pnand %p645_p3, %p642_p2 }
  0x2c   :  { %650 = shalt.err (!%p647_p4)
}
  0x2d   :  { %s651_s0 = scalar_lea.vmem %s43_s17, 256  ;;  %p656_p6 = scmp.lt.s32.totalorder %s43_s17, %s43_s17 }
  0x2e   :  { %p652_p5 = scmp.ne.s32.totalorder %s43_s17, %s651_s0  ;;  %p657_p7 = scmp.lt.s32.totalorder %s651_s0, %s651_s0 }
  0x30   :  { %p658_p8 = por %p657_p7, %p656_p6 }
  0x32   :  { %p659_p9 = pnand %p658_p8, %p652_p5 }
  0x34   :  { %662 = shalt.err (!%p659_p9)
}
  0x35   :  { %48 = dma.hbm_to_vmem [thread:$0]  %s885_s2, 256, %s43_s17, [#allocation6], %s716_s25, %s716_s25, %s717_s26  }
  0x36   :  { %s663_s7 = scalar_lea.hbm %s886_s3, 256 }
  0x37   :  { %p664_p10 = scmp.ne.s32.totalorder %s886_s3, %s663_s7  ;;  %p667_p11 = scmp.lt.u32.totalorder %s663_s7, %s886_s3 }
  0x39   :  { %p669_p12 = pnand %p667_p11, %p664_p10 }
  0x3b   :  { %672 = shalt.err (!%p669_p12)
}
  0x3c   :  { %s673_s12 = scalar_lea.vmem %s779_s19, 256  ;;  %p678_p0 = scmp.lt.s32.totalorder %s779_s19, %s779_s19 }
  0x3d   :  { %p674_p13 = scmp.ne.s32.totalorder %s779_s19, %s673_s12  ;;  %p679_p1 = scmp.lt.s32.totalorder %s673_s12, %s673_s12 }
  0x3f   :  { %p680_p2 = por %p679_p1, %p678_p0 }
  0x41   :  { %p681_p3 = pnand %p680_p2, %p674_p13 }
  0x43   :  { %684 = shalt.err (!%p681_p3)
}
  0x44   :  { %60 = dma.hbm_to_vmem [thread:$0]  %s886_s3, 256, %s779_s19, [#allocation9], %s716_s25, %s716_s25, %s717_s26  }
  0x45   :  { %707 = dma.done.wait [#allocation3], 32  }
  0x46   :  { %708 = vsyncadd [#allocation3], 4294967264 }
  0x47   :  { %709 = dma.done.wait [#allocation6], 512  }
  0x48   :  { %710 = vsyncadd [#allocation6], 4294966784 }
  0x49   :  { %711 = dma.done.wait [#allocation9], 256  }
  0x4a   :  { %712 = vsyncadd [#allocation9], 4294967040  ;;  %v723_v0 = vmov 0.0   ;;  %vm724_vm0 = vmmov 0   ;;  %v725_v1 = vmov 0   ;;  %vm81_vm1 = vcmask 261120  }
  0x4b   :  { %556 = vmatprep.subr.mxu0 %v723_v0  ;;  %561 = vmatprep.subr.mxu1 %v723_v0  ;;  %v75_v2 = vld [vmem:[#allocation7] sm:$0xff]  ;;  %v76_v3 = vld [vmem:[#allocation7 + $0x8] sm:$0xff]  ;;  %v73_v4 = vld [vmem:[#allocation5] sm:$0xff]  ;;  %v234_v10 = vlaneseq  ;;  %vm260_vm3 = vcmask 64512   ;;  %s726_s3 = smov [#allocation10]  }
  0x4c   :  { %558 = vmatprep.mubr.msk.f32.mxu0 %vm724_vm0, %v723_v0  ;;  %563 = vmatprep.mubr.msk.f32.mxu1 %vm724_vm0, %v723_v0  ;;  %v79_v5 = vmul.f32 0.17677669, %v73_v4  ;;  %v74_v6 = vld [vmem:[#allocation5 + $0x8] sm:$0xff]  ;;  %v236_v7 = vld [vmem:[#allocation2] sm:$0x1]  ;;  %s528_s13 = sshll.u32 %s726_s3, 4  ;;  %s529_s13 = int_to_ptr.vmem [resolvable:$true] %s528_s13 }
  0x4d   :  { %588 = vset.pattern.permute.xlu0 %v725_v1  ;;  %557 = vmatpush3.xpose.msk.msra.mxu0 %vm81_vm1, %v75_v2  ;;  %v80_v8 = vmul.f32 0.17677669, %v74_v6  ;;  %v237_v9 = vld [vmem:[#allocation2 + $0x1] sm:$0x1]  ;;  %v242_v11 = vshrl.u32 %v234_v10, 7  ;;  %v820_v15 = vand.u32 127, %v234_v10  ;;  %p690_p5 = scmp.lt.s32.totalorder %s529_s13, %s529_s13 }
  0x4e   :  { %562 = vmatpush3.xpose.msk.msra.mxu1 %vm81_vm1, %v76_v3  ;;  %239 = vperm.xlu0 %588, %v236_v7   ;;  %s685_s14 = scalar_lea.vmem %s529_s13, 256 }
  0x4f   :  { %566 = vmatprep.subr.mxu0 %v723_v0  ;;  %571 = vmatprep.subr.mxu1 %v723_v0  ;;  %v243_v13 = vsub.s32 0, %v242_v11  ;;  %p686_p4 = scmp.ne.s32.totalorder %s529_s13, %s685_s14  ;;  %p691_p6 = scmp.lt.s32.totalorder %s685_s14, %s685_s14 }
  0x50   :  { %559 = vmatmul.mubr.msk.f32.vlgmr.msra.gmra.mrb[0].mxu0 %vm81_vm1, %v79_v5 }
  0x51   :  { %564 = vmatmul.mubr.msk.f32.vlgmr.msra.gmra.mrb[0].mxu1 %vm81_vm1, %v80_v8  ;;  %568 = vmatprep.mubr.msk.f32.mxu0 %vm724_vm0, %v723_v0  ;;  %p692_p7 = por %p691_p6, %p690_p5 }
  0x52   :  { %573 = vmatprep.mubr.msk.f32.mxu1 %vm724_vm0, %v723_v0  ;;  %246 = vperm.xlu0 %588, %v237_v9  }
  0x53   :  { %p693_p8 = pnand %p692_p7, %p686_p4 }
  0xcd   :  { %v240_v12 = vpop.permute.xlu0 %239 }
  0xce   :  { %v244_v16 = vrot.slane %v240_v12, %v243_v13 }
  0xd0   :  { %vm252_vm2 = vcmp.lt.s32.totalorder %v820_v15, %v244_v16 }
  0xd1   :  { %v247_v14 = vpop.permute.xlu0 %246 }
  0xd2   :  { %v251_v17 = vrot.slane %v247_v14, %v243_v13 }
  0xd4   :  { %vm253_vm4 = vcmp.lt.s32.totalorder %v820_v15, %v251_v17 }
 0x123   :  { %v154_v18 = vpop.f32.mrb[0].mxu0 }
 0x124   :  { %v230_v19 = vpop.f32.mrb[0].mxu1  ;;  %v824_v20 = vsel %vm252_vm2, %v154_v18, -1000000.0  ;;  %v560_v21 = vpop.f32.mrb[1].mxu0 }
 0x125   :  { %v565_v22 = vpop.f32.mrb[1].mxu1  ;;  %v261_v23 = vsel %vm260_vm3, %v824_v20, -inf  ;;  %v828_v24 = vsel %vm253_vm4, %v230_v19, -1000000.0 }
 0x126   :  { %262 = vmax.xlane.f32.xlu1 %v261_v23  ;;  %v264_v25 = vsel %vm260_vm3, %v828_v24, -inf }
 0x12a   :  { %265 = vmax.xlane.f32.xlu1 %v264_v25 }
 0x1b3   :  { %v832_v26 = vpop.xlane.xlu1 %262 }
 0x1b4   :  { %vm267_vm5 = vcmp.eq.f32.partialorder %v824_v20, %v832_v26 }
 0x1b5   :  { %v269_v27 = vsel %vm267_vm5, %v820_v15, 8 }
 0x1b6   :  { %v271_v28 = vsel %vm260_vm3, %v269_v27, 2147483647 }
 0x1b7   :  { %v838_v29 = vpop.xlane.xlu1 %265  ;;  %v273_v30 = vshra.s32 %v271_v28, 16  ;;  %v272_v36 = vand.u32 65535, %v271_v28 }
 0x1b8   :  { %vm268_vm6 = vcmp.eq.f32.partialorder %v828_v24, %v838_v29 }
 0x1b9   :  { %v270_v31 = vsel %vm268_vm6, %v820_v15, 8  ;;  %v275_v32 = vcvt.s32.f32 %v273_v30  ;;  %v274_v38 = vcvt.s32.f32 %v272_v36 }
 0x1ba   :  { %v286_v33 = vsel %vm260_vm3, %v270_v31, 2147483647  ;;  %v77_v31 = vld [vmem:[#allocation8] sm:$0xff] }
 0x1bb   :  { %276 = vmin.xlane.f32.xlu0 %v275_v32  ;;  %v288_v34 = vshra.s32 %v286_v33, 16  ;;  %v287_v39 = vand.u32 65535, %v286_v33  ;;  %567 = vmatpush3.msra.mxu0 %v77_v31 }
 0x1bd   :  { %v290_v35 = vcvt.s32.f32 %v288_v34  ;;  %v289_v42 = vcvt.s32.f32 %v287_v39 }
 0x1bf   :  { %291 = vmin.xlane.f32.xlu1 %v290_v35 }
 0x248   :  { %v277_v37 = vpop.xlane.xlu0 %276 }
 0x249   :  { %vm278_vm7 = vcmp.eq.f32.partialorder %v275_v32, %v277_v37  ;;  %v283_v44 = vcvt.f32.s32 %v277_v37  ;;  %v78_v32 = vld [vmem:[#allocation8 + $0x8] sm:$0xff] }
 0x24a   :  { %v279_v40 = vsel %vm278_vm7, %v274_v38, inf  ;;  %572 = vmatpush3.msra.mxu1 %v78_v32 }
 0x24b   :  { %280 = vmin.xlane.f32.xlu1 %v279_v40  ;;  %v284_v46 = vshll.u32 %v283_v44, 16 }
 0x24c   :  { %v292_v41 = vpop.xlane.xlu1 %291 }
 0x24d   :  { %vm293_vm8 = vcmp.eq.f32.partialorder %v290_v35, %v292_v41  ;;  %v298_v47 = vcvt.f32.s32 %v292_v41 }
 0x24e   :  { %v294_v43 = vsel %vm293_vm8, %v289_v42, inf }
 0x24f   :  { %295 = vmin.xlane.f32.xlu1 %v294_v43  ;;  %v299_v51 = vshll.u32 %v298_v47, 16 }
 0x2d8   :  { %v281_v45 = vpop.xlane.xlu1 %280 }
 0x2d9   :  { %v282_v48 = vcvt.f32.s32 %v281_v45 }
 0x2db   :  { %v285_v49 = vadd.s32 %v284_v46, %v282_v48 }
 0x2dc   :  { %v296_v50 = vpop.xlane.xlu1 %295 }
 0x2dd   :  { %v297_v52 = vcvt.f32.s32 %v296_v50  ;;  %vm301_vm9 = vcmp.eq.s32.totalorder %v820_v15, %v285_v49 }
 0x2de   :  { %v303_v53 = vsel %vm301_vm9, -inf, %v824_v20 }
 0x2df   :  { %v300_v54 = vadd.s32 %v299_v51, %v297_v52  ;;  %v305_v55 = vsel %vm260_vm3, %v303_v53, -inf }
 0x2e0   :  { %306 = vmax.xlane.f32.xlu1 %v305_v55 }
 0x2e1   :  { %vm302_vm10 = vcmp.eq.s32.totalorder %v820_v15, %v300_v54 }
 0x2e2   :  { %v304_v56 = vsel %vm302_vm10, -inf, %v828_v24 }
 0x2e3   :  { %v308_v57 = vsel %vm260_vm3, %v304_v56, -inf }
 0x2e4   :  { %309 = vmax.xlane.f32.xlu1 %v308_v57 }
 0x36d   :  { %v307_v58 = vpop.xlane.xlu1 %306 }
 0x36e   :  { %vm311_vm11 = vcmp.eq.f32.partialorder %v303_v53, %v307_v58 }
 0x36f   :  { %v313_v59 = vsel %vm311_vm11, %v820_v15, 8 }
 0x370   :  { %v315_v60 = vsel %vm260_vm3, %v313_v59, 2147483647 }
 0x371   :  { %v310_v61 = vpop.xlane.xlu1 %309  ;;  %v317_v62 = vshra.s32 %v315_v60, 16  ;;  %v316_v4 = vand.u32 65535, %v315_v60 }
 0x372   :  { %vm312_vm12 = vcmp.eq.f32.partialorder %v304_v56, %v310_v61 }
 0x373   :  { %v314_v63 = vsel %vm312_vm12, %v820_v15, 8  ;;  %v319_v0 = vcvt.s32.f32 %v317_v62  ;;  %v318_v6 = vcvt.s32.f32 %v316_v4 }
 0x374   :  { %v330_v1 = vsel %vm260_vm3, %v314_v63, 2147483647 }
 0x375   :  { %320 = vmin.xlane.f32.xlu1 %v319_v0  ;;  %v332_v2 = vshra.s32 %v330_v1, 16  ;;  %v331_v7 = vand.u32 65535, %v330_v1 }
 0x377   :  { %v334_v3 = vcvt.s32.f32 %v332_v2  ;;  %v333_v10 = vcvt.s32.f32 %v331_v7 }
 0x379   :  { %335 = vmin.xlane.f32.xlu1 %v334_v3 }
 0x402   :  { %v321_v5 = vpop.xlane.xlu1 %320 }
 0x403   :  { %vm322_vm13 = vcmp.eq.f32.partialorder %v319_v0, %v321_v5  ;;  %v327_v12 = vcvt.f32.s32 %v321_v5 }
 0x404   :  { %v323_v8 = vsel %vm322_vm13, %v318_v6, inf }
 0x405   :  { %324 = vmin.xlane.f32.xlu1 %v323_v8  ;;  %v328_v14 = vshll.u32 %v327_v12, 16 }
 0x406   :  { %v336_v9 = vpop.xlane.xlu1 %335 }
 0x407   :  { %vm337_vm14 = vcmp.eq.f32.partialorder %v334_v3, %v336_v9  ;;  %v342_v16 = vcvt.f32.s32 %v336_v9 }
 0x408   :  { %v338_v11 = vsel %vm337_vm14, %v333_v10, inf }
 0x409   :  { %339 = vmin.xlane.f32.xlu0 %v338_v11  ;;  %v343_v21 = vshll.u32 %v342_v16, 16 }
 0x492   :  { %v325_v13 = vpop.xlane.xlu1 %324 }
 0x493   :  { %v326_v17 = vcvt.f32.s32 %v325_v13 }
 0x495   :  { %v329_v18 = vadd.s32 %v328_v14, %v326_v17 }
 0x496   :  { %v340_v19 = vpop.xlane.xlu0 %339 }
 0x497   :  { %v341_v22 = vcvt.f32.s32 %v340_v19  ;;  %vm345_vm15 = vcmp.eq.s32.totalorder %v820_v15, %v329_v18 }
 0x498   :  { %v347_v23 = vsel %vm345_vm15, -inf, %v303_v53 }
 0x499   :  { %v344_v25 = vadd.s32 %v343_v21, %v341_v22  ;;  %v349_v27 = vsel %vm260_vm3, %v347_v23, -inf }
 0x49a   :  { %350 = vmax.xlane.f32.xlu1 %v349_v27 }
 0x49b   :  { %vm346_vm0 = vcmp.eq.s32.totalorder %v820_v15, %v344_v25 }
 0x49c   :  { %v348_v28 = vsel %vm346_vm0, -inf, %v304_v56 }
 0x49d   :  { %v352_v30 = vsel %vm260_vm3, %v348_v28, -inf }
 0x49e   :  { %353 = vmax.xlane.f32.xlu0 %v352_v30 }
 0x527   :  { %v351_v33 = vpop.xlane.xlu1 %350 }
 0x528   :  { %vm355_vm1 = vcmp.ge.f32.partialorder %v824_v20, %v351_v33 }
 0x529   :  { %v357_v34 = vsel %vm355_vm1, %v824_v20, -1000000.0 }
 0x52a   :  { %v359_v35 = vsub.f32 %v357_v34, %v832_v26 }
 0x52b   :  { %v354_v36 = vpop.xlane.xlu0 %353 }
 0x52c   :  { %v361_v37 = vmul.f32 1.442695, %v359_v35  ;;  %vm356_vm2 = vcmp.ge.f32.partialorder %v828_v24, %v354_v36 }
 0x52d   :  { %v358_v15 = vsel %vm356_vm2, %v828_v24, -1000000.0 }
 0x52e   :  { %589 = vpow2.f32 %v361_v37  ;;  %v360_v38 = vsub.f32 %v358_v15, %v838_v29 }
 0x530   :  { %v363_v39 = vmul.f32 1.442695, %v360_v38 }
 0x532   :  { %591 = vpow2.f32 %v363_v39 }
 0x538   :  { %v590_v40 = vpop.eup %589 }
 0x539   :  { %569 = vmatmul.mubr.msk.f32.vlgmr.msra.gmra.mrb[2].mxu0 %vm260_vm3, %v590_v40  ;;  %v365_v41 = vsel %vm260_vm3, %v590_v40, 0.0 }
 0x53a   :  { %366 = vadd.xlane.f32.xlu1 %v365_v41 }
 0x53c   :  { %v592_v20 = vpop.eup %591 }
 0x53d   :  { %574 = vmatmul.mubr.msk.f32.vlgmr.msra.gmra.mrb[2].mxu1 %vm260_vm3, %v592_v20  ;;  %v368_v26 = vsel %vm260_vm3, %v592_v20, 0.0 }
 0x53e   :  { %369 = vadd.xlane.f32.xlu0 %v368_v26 }
 0x5c7   :  { %v367_v42 = vpop.xlane.xlu1 %366 }
 0x5c8   :  { %593 = vrcp.f32 %v367_v42 }
 0x5cb   :  { %v370_v24 = vpop.xlane.xlu0 %369 }
 0x5cc   :  { %595 = vrcp.f32 %v370_v24 }
 0x5d2   :  { %v594_v43 = vpop.eup %593 }
 0x5d6   :  { %v596_v46 = vpop.eup %595 }
 0x60c   :  { %v440_v29 = vpop.f32.mrb[2].mxu0 }
 0x60d   :  { %v519_v44 = vmul.f32 %v594_v43, %v440_v29  ;;  %v570_v45 = vpop.f32.mrb[3].mxu0 }
 0x60f   :  { %521 = vst [vmem:[#allocation10] sm:$0xff] %v519_v44 }
 0x610   :  { %v513_v47 = vpop.f32.mrb[2].mxu1 }
 0x611   :  { %v520_v48 = vmul.f32 %v596_v46, %v513_v47  ;;  %v575_v49 = vpop.f32.mrb[3].mxu1 }
 0x613   :  { %522 = vst [vmem:[#allocation10 + $0x8] sm:$0xff] %v520_v48 }
 0x614   :  { %696 = shalt.err (!%p693_p8)
}
 0x615   :  { %s697_s17 = scalar_lea.hbm %s887_s4, 256 }
 0x616   :  { %p698_p9 = scmp.ne.s32.totalorder %s887_s4, %s697_s17  ;;  %p701_p10 = scmp.lt.u32.totalorder %s697_s17, %s887_s4 }
 0x618   :  { %p703_p11 = pnand %p701_p10, %p698_p9 }
 0x61a   :  { %706 = shalt.err (!%p703_p11)
}
 0x61b   :  { %534 = dma.vmem_to_hbm [thread:$0]  %s529_s13, 256, %s887_s4, [#allocation4], %s716_s25, %s716_s25, %s717_s26  }
 0x61c   :  { %713 = dma.done.wait [#allocation4], 256  }
 0x61d   :  { %714 = vsyncadd [#allocation4], 4294967040 }
 0x61e   :  { %538 = vsyncpa [#allocation3], 1 }
 0x61f   :  { %539 = vsyncpa [#allocation6], 1 }
 0x620   :  { %540 = vsyncpa [#allocation9], 1 }
 0x621   :  { %541 = vsyncpa [#allocation4], 1 }

</bundles_post_ra>
